<compile_context>
chip_gen: v7x
topology: tpu7x:2x2x1
jax: 0.10.0
libtpu: 0.0.40
codegen_flags: <defaults>
</compile_context>

<pallas_src>
import functools

import jax
import jax.numpy as jnp
from jax.experimental import pallas as pl
from jax.experimental.pallas import tpu as pltpu

BN_EPS = 1e-5


def _convblock_kernel(x_ref, wt_ref, gamma_ref, beta_ref, mask_ref, o_ref,
                      s1_ref, s2_ref, scale_ref, shift_ref, *, dims):
    """Fused conv KHxKW (valid, stride 1) + batch-stat BN + ReLU, two-phase grid.

    grid = (phase, frame):
      phase 0: conv tile -> masked per-channel sum / sum-of-squares into scratch;
               at the last frame derive scale/shift.
      phase 1: recompute conv tile, apply affine + ReLU, write lane-dense output.

    x_ref:     (1, Cin_p, FW)          bf16  one frame, channel-major, zero tail
    wt_ref:    (Cout, KH*KW*Cin_p)     bf16  K rows ordered (kh, kw, c)
    gamma_ref: (Cout, 1)               f32
    beta_ref:  (Cout, 1)               f32
    mask_ref:  (1, H*W)                f32   1.0 where (h < Ho and w < Wo)
    o_ref:     (1, Cout, H*W)          f32   lane-dense; columns ordered (h, w)
    scratch:   s1, s2, scale, shift    f32 (Cout, 1)
    """
    N, H, W, KH, KW, Ho, Wo = dims
    HW = H * W
    phase = pl.program_id(0)
    n = pl.program_id(1)

    # --- conv for this frame. Each tap is a plain lane slice of the flattened frame
    # (offset kh*W + kw); taps are concatenated along sublanes into one patch matrix
    # (per-tile only) and pushed through the MXU once.  Operands bf16, accumulate f32.
    # Valid output columns never read past their own frame; edge columns that do read
    # the zero tail are invalid and get masked / cropped.
    x = x_ref[0]                                              # (Cin_p, FW) bf16
    taps = []
    for kh in range(KH):
        for kw in range(KW):
            s = kh * W + kw
            taps.append(x[:, s:s + HW])                       # (Cin_p, HW) bf16
    patches = jnp.concatenate(taps, axis=0)                   # (KH*KW*Cin_p, HW) bf16
    conv = jnp.dot(wt_ref[...], patches,
                   preferred_element_type=jnp.float32)        # (Cout, HW) f32
    # Conv bias intentionally omitted: training-mode BN subtracts the batch mean of
    # these outputs, which cancels a per-channel additive bias exactly.

    @pl.when((phase == 0) & (n == 0))
    def _init():
        s1_ref[...] = jnp.zeros_like(s1_ref)
        s2_ref[...] = jnp.zeros_like(s2_ref)

    @pl.when(phase == 0)
    def _accumulate():
        m = mask_ref[...]                                     # (1, HW) f32
        cm = conv * m
        s1_ref[...] += jnp.sum(cm, axis=1, keepdims=True)
        s2_ref[...] += jnp.sum(cm * conv, axis=1, keepdims=True)

    @pl.when((phase == 0) & (n == N - 1))
    def _finalize_stats():
        inv_cnt = 1.0 / float(N * Ho * Wo)
        mean = s1_ref[...] * inv_cnt
        # Clamp: one-pass E[x^2]-E[x]^2 can go slightly negative under cancellation.
        var = jnp.maximum(s2_ref[...] * inv_cnt - mean * mean, 0.0)
        scale = gamma_ref[...] * jax.lax.rsqrt(var + BN_EPS)
        scale_ref[...] = scale
        shift_ref[...] = beta_ref[...] - scale * mean

    @pl.when(phase == 1)
    def _apply():
        # Invalid columns carry finite garbage; wrapper crops them.
        o_ref[0] = jnp.maximum(conv * scale_ref[...] + shift_ref[...], 0.0)


@jax.jit
def conv_block(x_nchw, w_oihw, bias, gamma, beta):
    """ConvBlock forward. NCHW in / NCHW out; conv weight in PyTorch OIHW layout.

    `bias` is accepted for signature parity with nn.Conv2d but unused: training-mode
    BatchNorm cancels it exactly (see kernel comment).
    """
    del bias
    N, Cin, H, W = x_nchw.shape
    Cout, _, KH, KW = w_oihw.shape
    Ho, Wo = H - KH + 1, W - KW + 1
    HW = H * W
    tail = (KH - 1) * W + (KW - 1)
    Cin_p = ((Cin + 15) // 16) * 16                 # bf16 sublane-pack alignment
    FW = ((HW + tail + 127) // 128) * 128           # lane-aligned per-frame width
    K = KH * KW * Cin_p

    # Input: (N, Cin, H, W) -> (N, Cin_p, FW) bf16. Per-frame channel-major needs no
    # transpose; channel pad and frame tail pad are merged into one jnp.pad.
    x_t = x_nchw.astype(jnp.float32).reshape(N, Cin, HW)
    x_t = jnp.pad(x_t, ((0, 0), (0, Cin_p - Cin), (0, FW - HW))).astype(jnp.bfloat16)

    # Weights as (Cout, K) bf16 with K ordered (kh, kw, c) to match the patch rows.
    w_p = jnp.pad(w_oihw.astype(jnp.float32), ((0, 0), (0, Cin_p - Cin), (0, 0), (0, 0)))
    w_t = jnp.transpose(w_p, (0, 2, 3, 1)).reshape(Cout, K).astype(jnp.bfloat16)

    # Per-frame validity mask (same for every frame): 1 where h < Ho and w < Wo.
    mask = ((jnp.arange(H)[:, None] < Ho) & (jnp.arange(W)[None, :] < Wo))
    mask = mask.reshape(1, HW).astype(jnp.float32)

    kernel = functools.partial(_convblock_kernel, dims=(N, H, W, KH, KW, Ho, Wo))

    flops = 2 * 2 * N * HW * K * Cout               # conv recomputed in both phases
    bytes_accessed = (2 * 2 * x_t.size + 2 * w_t.size + 4 * mask.size
                      + 4 * 2 * Cout + 4 * N * Cout * HW)

    grid_spec = pltpu.PrefetchScalarGridSpec(
        num_scalar_prefetch=0,
        grid=(2, N),                                # (phase, frame)
        in_specs=[
            pl.BlockSpec((1, Cin_p, FW), lambda p, n: (n, 0, 0)),
            pl.BlockSpec((Cout, K), lambda p, n: (0, 0)),
            pl.BlockSpec((Cout, 1), lambda p, n: (0, 0)),
            pl.BlockSpec((Cout, 1), lambda p, n: (0, 0)),
            pl.BlockSpec((1, HW), lambda p, n: (0, 0)),
        ],
        # Phase 0 never writes; pinning its output index to block 0 (p*n == 0) keeps
        # that block resident (no garbage HBM writeback) until phase 1 overwrites it.
        out_specs=pl.BlockSpec((1, Cout, HW), lambda p, n: (p * n, 0, 0)),
        scratch_shapes=[
            pltpu.VMEM((Cout, 1), jnp.float32),     # s1  (masked sum)
            pltpu.VMEM((Cout, 1), jnp.float32),     # s2  (masked sum of squares)
            pltpu.VMEM((Cout, 1), jnp.float32),     # scale
            pltpu.VMEM((Cout, 1), jnp.float32),     # shift
        ],
    )

    out_t = pl.pallas_call(
        kernel,
        out_shape=jax.ShapeDtypeStruct((N, Cout, HW), jnp.float32),
        grid_spec=grid_spec,
        compiler_params=pltpu.CompilerParams(
            # Both axes are reductions/dependent (batch-stat BN couples all frames;
            # phase 1 needs phase 0's stats) -> "arbitrary". See v7x TODO above.
            dimension_semantics=("arbitrary", "arbitrary"),
            vmem_limit_bytes=32 * 1024 * 1024,
        ),
        cost_estimate=pl.CostEstimate(flops=flops, transcendentals=Cout,
                                      bytes_accessed=bytes_accessed),
    )(
        x_t,
        w_t,
        gamma.reshape(Cout, 1).astype(jnp.float32),
        beta.reshape(Cout, 1).astype(jnp.float32),
        mask,
    )

    # (N, Cout, H*W) is already NCHW-ordered: reshape + crop only, no transpose.
    # TODO(synk): fuse this crop into the consumer (or write cropped rows directly).
    return out_t.reshape(N, Cout, H, W)[:, :, :Ho, :Wo]


def _reference(x_nchw, w_oihw, bias, gamma, beta):
    """Pure-JAX reference (includes the conv bias, which training-mode BN cancels)."""
    conv = jax.lax.conv_general_dilated(
        x_nchw, w_oihw, window_strides=(1, 1), padding="VALID",
        dimension_numbers=("NCHW", "OIHW", "NCHW"),
    ) + bias[None, :, None, None]
    mean = conv.mean(axis=(0, 2, 3), keepdims=True)
    var = conv.var(axis=(0, 2, 3), keepdims=True)               # biased variance
    y = gamma[None, :, None, None] * (conv - mean) * jax.lax.rsqrt(var + BN_EPS) \
        + beta[None, :, None, None]
    return jnp.maximum(y, 0.0)


if __name__ == "__main__":
    # ConvBlock(in_=4, out_=8, kernel_size=3, stride=1, padding=0)
    N, Cin, H, W = 2, 4, 16, 16
    Cout, KH, KW = 8, 3, 3

    key = jax.random.PRNGKey(0)
    kx, kw_, kb, kg, kbe = jax.random.split(key, 5)

    x = jax.random.normal(kx, (N, Cin, H, W), dtype=jnp.float32)
    w = jax.random.normal(kw_, (Cout, Cin, KH, KW), dtype=jnp.float32) * 0.1
    b = jax.random.normal(kb, (Cout,), dtype=jnp.float32) * 0.1
    gamma = 1.0 + 0.1 * jax.random.normal(kg, (Cout,), dtype=jnp.float32)
    beta = 0.1 * jax.random.normal(kbe, (Cout,), dtype=jnp.float32)

    out = jax.block_until_ready(conv_block(x, w, b, gamma, beta))
    assert out.shape == (N, Cout, H - KH + 1, W - KW + 1)

    # Tight check vs a reference fed the same bf16-rounded matmul operands (the kernel
    # accumulates in f32 on the MXU), loose check vs the pure-f32 reference.
    x_bf = x.astype(jnp.bfloat16).astype(jnp.float32)
    w_bf = w.astype(jnp.bfloat16).astype(jnp.float32)
    ref_bf = _reference(x_bf, w_bf, b, gamma, beta)
    ref_f32 = _reference(x, w, b, gamma, beta)
    assert jnp.allclose(out, ref_bf, atol=2e-3, rtol=2e-3), \
        "mismatch vs bf16-operand reference"
    assert jnp.allclose(out, ref_f32, atol=5e-2, rtol=5e-2), \
        "mismatch vs f32 reference"

    print("KERNEL_OK")
</pallas_src>

<mosaic_0001>
module attributes {stable_mosaic.version = 11 : i64} {
  func.func @_convblock_kernel(%arg0: i32, %arg1: i32, %arg2: memref<1x16x384xbf16, #tpu.memory_space<vmem>>, %arg3: memref<8x144xbf16, #tpu.memory_space<vmem>>, %arg4: memref<8x1xf32, #tpu.memory_space<vmem>>, %arg5: memref<8x1xf32, #tpu.memory_space<vmem>>, %arg6: memref<1x256xf32, #tpu.memory_space<vmem>>, %arg7: memref<1x8x256xf32, #tpu.memory_space<vmem>>, %arg8: memref<8x1xf32, #tpu.memory_space<vmem>>, %arg9: memref<8x1xf32, #tpu.memory_space<vmem>>, %arg10: memref<8x1xf32, #tpu.memory_space<vmem>>, %arg11: memref<8x1xf32, #tpu.memory_space<vmem>>) attributes {dimension_semantics = [#tpu.dimension_semantics<arbitrary>, #tpu.dimension_semantics<arbitrary>], iteration_bounds = array<i64: 2, 2>, scalar_prefetch = 0 : i64, scratch_operands = 4 : i64, tpu.core_type = #tpu.core_type<tc>, window_params = [{transform_indices = @transform_0, window_bounds = array<i64: 1, 16, 384>}, {pipeline_mode = #tpu.pipeline_mode<synchronous>, transform_indices = @transform_1, window_bounds = array<i64: 8, 144>}, {pipeline_mode = #tpu.pipeline_mode<synchronous>, transform_indices = @transform_2, window_bounds = array<i64: 8, 1>}, {pipeline_mode = #tpu.pipeline_mode<synchronous>, transform_indices = @transform_3, window_bounds = array<i64: 8, 1>}, {pipeline_mode = #tpu.pipeline_mode<synchronous>, transform_indices = @transform_4, window_bounds = array<i64: 1, 256>}, {transform_indices = @transform_5, window_bounds = array<i64: 1, 8, 256>}]} {
    %c0 = arith.constant 0 : index
    %c0_0 = arith.constant 0 : index
    %c0_1 = arith.constant 0 : index
    %0 = vector.load %arg2[%c0, %c0_0, %c0_1] : memref<1x16x384xbf16, #tpu.memory_space<vmem>>, vector<1x16x384xbf16>
    %1 = vector.shape_cast %0 : vector<1x16x384xbf16> to vector<16x384xbf16>
    %2 = vector.extract_strided_slice %1 {offsets = [0, 0], sizes = [16, 256], strides = [1, 1]} : vector<16x384xbf16> to vector<16x256xbf16>
    %3 = vector.extract_strided_slice %1 {offsets = [0, 1], sizes = [16, 256], strides = [1, 1]} : vector<16x384xbf16> to vector<16x256xbf16>
    %4 = vector.extract_strided_slice %1 {offsets = [0, 2], sizes = [16, 256], strides = [1, 1]} : vector<16x384xbf16> to vector<16x256xbf16>
    %5 = vector.extract_strided_slice %1 {offsets = [0, 16], sizes = [16, 256], strides = [1, 1]} : vector<16x384xbf16> to vector<16x256xbf16>
    %6 = vector.extract_strided_slice %1 {offsets = [0, 17], sizes = [16, 256], strides = [1, 1]} : vector<16x384xbf16> to vector<16x256xbf16>
    %7 = vector.extract_strided_slice %1 {offsets = [0, 18], sizes = [16, 256], strides = [1, 1]} : vector<16x384xbf16> to vector<16x256xbf16>
    %8 = vector.extract_strided_slice %1 {offsets = [0, 32], sizes = [16, 256], strides = [1, 1]} : vector<16x384xbf16> to vector<16x256xbf16>
    %9 = vector.extract_strided_slice %1 {offsets = [0, 33], sizes = [16, 256], strides = [1, 1]} : vector<16x384xbf16> to vector<16x256xbf16>
    %10 = vector.extract_strided_slice %1 {offsets = [0, 34], sizes = [16, 256], strides = [1, 1]} : vector<16x384xbf16> to vector<16x256xbf16>
    %11 = tpu.concatenate %2, %3, %4, %5, %6, %7, %8, %9, %10 in 0 : vector<16x256xbf16>, vector<16x256xbf16>, vector<16x256xbf16>, vector<16x256xbf16>, vector<16x256xbf16>, vector<16x256xbf16>, vector<16x256xbf16>, vector<16x256xbf16>, vector<16x256xbf16> -> vector<144x256xbf16>
    %c0_2 = arith.constant 0 : index
    %c0_3 = arith.constant 0 : index
    %12 = vector.load %arg3[%c0_2, %c0_3] : memref<8x144xbf16, #tpu.memory_space<vmem>>, vector<8x144xbf16>
    %cst = arith.constant dense<0.000000e+00> : vector<8x256xf32>
    %13 = tpu.matmul %12, %11, %cst {dimension_numbers = #tpu.dot_dimension_numbers<[1], [0], [0], [1], [0, 0, 1, 1], [], []>} : vector<8x144xbf16>, vector<144x256xbf16>, vector<8x256xf32> -> vector<8x256xf32>
    %c0_i32 = arith.constant 0 : i32
    %14 = arith.cmpi eq, %arg0, %c0_i32 : i32
    %c0_i32_4 = arith.constant 0 : i32
    %15 = arith.cmpi eq, %arg1, %c0_i32_4 : i32
    %16 = arith.andi %14, %15 : i1
    %17 = arith.extui %16 : i1 to i32
    %c0_i32_5 = arith.constant 0 : i32
    %18 = arith.cmpi ne, %17, %c0_i32_5 : i32
    scf.if %18 {
      %cst_12 = arith.constant 0.000000e+00 : f32
      %30 = vector.broadcast %cst_12 : f32 to vector<8x1xf32>
      %c0_13 = arith.constant 0 : index
      %c0_14 = arith.constant 0 : index
      %31 = vector.load %arg8[%c0_13, %c0_14] : memref<8x1xf32, #tpu.memory_space<vmem>>, vector<8x1xf32>
      tpu.vector_store %arg8[%c0_13, %c0_14], %30 {strides = array<i32>} : memref<8x1xf32, #tpu.memory_space<vmem>>, vector<8x1xf32>,
      %cst_15 = arith.constant 0.000000e+00 : f32
      %32 = vector.broadcast %cst_15 : f32 to vector<8x1xf32>
      %c0_16 = arith.constant 0 : index
      %c0_17 = arith.constant 0 : index
      %33 = vector.load %arg9[%c0_16, %c0_17] : memref<8x1xf32, #tpu.memory_space<vmem>>, vector<8x1xf32>
      tpu.vector_store %arg9[%c0_16, %c0_17], %32 {strides = array<i32>} : memref<8x1xf32, #tpu.memory_space<vmem>>, vector<8x1xf32>,
    } else {
    }
    %c0_i32_6 = arith.constant 0 : i32
    %19 = arith.cmpi eq, %arg0, %c0_i32_6 : i32
    %20 = arith.extui %19 : i1 to i32
    %c0_i32_7 = arith.constant 0 : i32
    %21 = arith.cmpi ne, %20, %c0_i32_7 : i32
    scf.if %21 {
      %c0_12 = arith.constant 0 : index
      %c0_13 = arith.constant 0 : index
      %30 = vector.load %arg6[%c0_12, %c0_13] : memref<1x256xf32, #tpu.memory_space<vmem>>, vector<1x256xf32>
      %31 = vector.broadcast %30 : vector<1x256xf32> to vector<8x256xf32>
      %32 = arith.mulf %13, %31 : vector<8x256xf32>
      %c0_14 = arith.constant 0 : index
      %c0_15 = arith.constant 0 : index
      %33 = vector.load %arg8[%c0_14, %c0_15] : memref<8x1xf32, #tpu.memory_space<vmem>>, vector<8x1xf32>
      %cst_16 = arith.constant dense<0.000000e+00> : vector<8xf32>
      %34 = vector.multi_reduction <add>, %32, %cst_16 [1] : vector<8x256xf32> to vector<8xf32>
      %35 = vector.shape_cast %34 : vector<8xf32> to vector<8x1xf32>
      %36 = arith.addf %33, %35 : vector<8x1xf32>
      %c0_17 = arith.constant 0 : index
      %c0_18 = arith.constant 0 : index
      %37 = vector.load %arg8[%c0_17, %c0_18] : memref<8x1xf32, #tpu.memory_space<vmem>>, vector<8x1xf32>
      tpu.vector_store %arg8[%c0_17, %c0_18], %36 {strides = array<i32>} : memref<8x1xf32, #tpu.memory_space<vmem>>, vector<8x1xf32>,
      %c0_19 = arith.constant 0 : index
      %c0_20 = arith.constant 0 : index
      %38 = vector.load %arg9[%c0_19, %c0_20] : memref<8x1xf32, #tpu.memory_space<vmem>>, vector<8x1xf32>
      %39 = arith.mulf %32, %13 : vector<8x256xf32>
      %cst_21 = arith.constant dense<0.000000e+00> : vector<8xf32>
      %40 = vector.multi_reduction <add>, %39, %cst_21 [1] : vector<8x256xf32> to vector<8xf32>
      %41 = vector.shape_cast %40 : vector<8xf32> to vector<8x1xf32>
      %42 = arith.addf %38, %41 : vector<8x1xf32>
      %c0_22 = arith.constant 0 : index
      %c0_23 = arith.constant 0 : index
      %43 = vector.load %arg9[%c0_22, %c0_23] : memref<8x1xf32, #tpu.memory_space<vmem>>, vector<8x1xf32>
      tpu.vector_store %arg9[%c0_22, %c0_23], %42 {strides = array<i32>} : memref<8x1xf32, #tpu.memory_space<vmem>>, vector<8x1xf32>,
    } else {
    }
    %c0_i32_8 = arith.constant 0 : i32
    %22 = arith.cmpi eq, %arg0, %c0_i32_8 : i32
    %c1_i32 = arith.constant 1 : i32
    %23 = arith.cmpi eq, %arg1, %c1_i32 : i32
    %24 = arith.andi %22, %23 : i1
    %25 = arith.extui %24 : i1 to i32
    %c0_i32_9 = arith.constant 0 : i32
    %26 = arith.cmpi ne, %25, %c0_i32_9 : i32
    scf.if %26 {
      %c0_12 = arith.constant 0 : index
      %c0_13 = arith.constant 0 : index
      %30 = vector.load %arg8[%c0_12, %c0_13] : memref<8x1xf32, #tpu.memory_space<vmem>>, vector<8x1xf32>
      %cst_14 = arith.constant 0.00255102036 : f32
      %31 = vector.broadcast %cst_14 : f32 to vector<8x1xf32>
      %32 = arith.mulf %30, %31 : vector<8x1xf32>
      %c0_15 = arith.constant 0 : index
      %c0_16 = arith.constant 0 : index
      %33 = vector.load %arg9[%c0_15, %c0_16] : memref<8x1xf32, #tpu.memory_space<vmem>>, vector<8x1xf32>
      %cst_17 = arith.constant 0.00255102036 : f32
      %34 = vector.broadcast %cst_17 : f32 to vector<8x1xf32>
      %35 = arith.mulf %33, %34 : vector<8x1xf32>
      %36 = arith.mulf %32, %32 : vector<8x1xf32>
      %37 = arith.subf %35, %36 : vector<8x1xf32>
      %cst_18 = arith.constant 0.000000e+00 : f32
      %38 = vector.broadcast %cst_18 : f32 to vector<8x1xf32>
      %39 = arith.maximumf %37, %38 : vector<8x1xf32>
      %c0_19 = arith.constant 0 : index
      %c0_20 = arith.constant 0 : index
      %40 = vector.load %arg4[%c0_19, %c0_20] : memref<8x1xf32, #tpu.memory_space<vmem>>, vector<8x1xf32>
      %cst_21 = arith.constant 9.99999974E-6 : f32
      %41 = vector.broadcast %cst_21 : f32 to vector<8x1xf32>
      %42 = arith.addf %39, %41 : vector<8x1xf32>
      %43 = math.rsqrt %42 : vector<8x1xf32>
      %44 = arith.mulf %40, %43 : vector<8x1xf32>
      %c0_22 = arith.constant 0 : index
      %c0_23 = arith.constant 0 : index
      %45 = vector.load %arg10[%c0_22, %c0_23] : memref<8x1xf32, #tpu.memory_space<vmem>>, vector<8x1xf32>
      tpu.vector_store %arg10[%c0_22, %c0_23], %44 {strides = array<i32>} : memref<8x1xf32, #tpu.memory_space<vmem>>, vector<8x1xf32>,
      %c0_24 = arith.constant 0 : index
      %c0_25 = arith.constant 0 : index
      %46 = vector.load %arg5[%c0_24, %c0_25] : memref<8x1xf32, #tpu.memory_space<vmem>>, vector<8x1xf32>
      %47 = arith.mulf %44, %32 : vector<8x1xf32>
      %48 = arith.subf %46, %47 : vector<8x1xf32>
      %c0_26 = arith.constant 0 : index
      %c0_27 = arith.constant 0 : index
      %49 = vector.load %arg11[%c0_26, %c0_27] : memref<8x1xf32, #tpu.memory_space<vmem>>, vector<8x1xf32>
      tpu.vector_store %arg11[%c0_26, %c0_27], %48 {strides = array<i32>} : memref<8x1xf32, #tpu.memory_space<vmem>>, vector<8x1xf32>,
    } else {
    }
    %c1_i32_10 = arith.constant 1 : i32
    %27 = arith.cmpi eq, %arg0, %c1_i32_10 : i32
    %28 = arith.extui %27 : i1 to i32
    %c0_i32_11 = arith.constant 0 : i32
    %29 = arith.cmpi ne, %28, %c0_i32_11 : i32
    scf.if %29 {
      %c0_12 = arith.constant 0 : index
      %c0_13 = arith.constant 0 : index
      %30 = vector.load %arg10[%c0_12, %c0_13] : memref<8x1xf32, #tpu.memory_space<vmem>>, vector<8x1xf32>
      %31 = vector.broadcast %30 : vector<8x1xf32> to vector<8x256xf32>
      %32 = arith.mulf %13, %31 : vector<8x256xf32>
      %c0_14 = arith.constant 0 : index
      %c0_15 = arith.constant 0 : index
      %33 = vector.load %arg11[%c0_14, %c0_15] : memref<8x1xf32, #tpu.memory_space<vmem>>, vector<8x1xf32>
      %34 = vector.broadcast %33 : vector<8x1xf32> to vector<8x256xf32>
      %35 = arith.addf %32, %34 : vector<8x256xf32>
      %cst_16 = arith.constant 0.000000e+00 : f32
      %36 = vector.broadcast %cst_16 : f32 to vector<8x256xf32>
      %37 = arith.maximumf %35, %36 : vector<8x256xf32>
      %c0_17 = arith.constant 0 : index
      %c0_18 = arith.constant 0 : index
      %c0_19 = arith.constant 0 : index
      %38 = vector.load %arg7[%c0_17, %c0_18, %c0_19] : memref<1x8x256xf32, #tpu.memory_space<vmem>>, vector<1x8x256xf32>
      %39 = vector.shape_cast %38 : vector<1x8x256xf32> to vector<8x256xf32>
      %40 = vector.shape_cast %37 : vector<8x256xf32> to vector<1x8x256xf32>
      tpu.vector_store %arg7[%c0_17, %c0_18, %c0_19], %40 {strides = array<i32>} : memref<1x8x256xf32, #tpu.memory_space<vmem>>, vector<1x8x256xf32>,
    } else {
    }
    return
  }
  func.func @transform_0(%arg0: i32, %arg1: i32) -> (i32, i32, i32) {
    %c0_i32 = arith.constant 0 : i32
    %c0_i32_0 = arith.constant 0 : i32
    %c0_i32_1 = arith.constant 0 : i32
    return %arg1, %c0_i32, %c0_i32_0 : i32, i32, i32
  }
  func.func @transform_1(%arg0: i32, %arg1: i32) -> (i32, i32) {
    %c0_i32 = arith.constant 0 : i32
    %c0_i32_0 = arith.constant 0 : i32
    %c0_i32_1 = arith.constant 0 : i32
    return %c0_i32, %c0_i32_0 : i32, i32
  }
  func.func @transform_2(%arg0: i32, %arg1: i32) -> (i32, i32) {
    %c0_i32 = arith.constant 0 : i32
    %c0_i32_0 = arith.constant 0 : i32
    %c0_i32_1 = arith.constant 0 : i32
    return %c0_i32, %c0_i32_0 : i32, i32
  }
  func.func @transform_3(%arg0: i32, %arg1: i32) -> (i32, i32) {
    %c0_i32 = arith.constant 0 : i32
    %c0_i32_0 = arith.constant 0 : i32
    %c0_i32_1 = arith.constant 0 : i32
    return %c0_i32, %c0_i32_0 : i32, i32
  }
  func.func @transform_4(%arg0: i32, %arg1: i32) -> (i32, i32) {
    %c0_i32 = arith.constant 0 : i32
    %c0_i32_0 = arith.constant 0 : i32
    %c0_i32_1 = arith.constant 0 : i32
    return %c0_i32, %c0_i32_0 : i32, i32
  }
  func.func @transform_5(%arg0: i32, %arg1: i32) -> (i32, i32, i32) {
    %0 = arith.muli %arg0, %arg1 : i32
    %c0_i32 = arith.constant 0 : i32
    %c0_i32_0 = arith.constant 0 : i32
    %c0_i32_1 = arith.constant 0 : i32
    return %0, %c0_i32, %c0_i32_0 : i32, i32, i32
  }
}

</mosaic_0001>

<bundles_post_ra>
// kernel: conv_block.1
= control target key start
LH: loop header
LB: loop body
LE: loop exit
PB: predicated region body
PF: predicated region fallthrough
CT: control target
= control target key end

     0   :  { %s718_s18 = smov 0   ;;  %s720_s19 = smov 0   ;;  %s818_s0 = inlined_call_operand.vmem [shape: bf16[2,16,384], index: 0, kind: input, shape index: {}]   ;;  %s819_s1 = inlined_call_operand.vmem [shape: bf16[8,144], index: 1, kind: input, shape index: {}]   ;;  %s820_s2 = inlined_call_operand.vmem [shape: f32[8,1], index: 2, kind: input, shape index: {}]   ;;  %s821_s3 = inlined_call_operand.vmem [shape: f32[8,1], index: 3, kind: input, shape index: {}]   ;;  %s822_s4 = inlined_call_operand.vmem [shape: f32[1,256], index: 4, kind: input, shape index: {}]   ;;  %s823_s5 = inlined_call_operand.vmem [shape: f32[2,8,256], index: 5, kind: output, shape index: {}]  }
   0x1   :  { %s722_s20 = smov 0   ;;  %s724_s21 = smov 0  }
   0x2   :  { %s726_s22 = smov 0  }
   0x3 LB: > { %s24_s23 = sadd.s32 1, %s668_s20  ;;  %s27_s24 = sadd.s32 1, %s672_s21  ;;  %s676_s22 = sphi %s726_s22, %s15_s22   ;;  %s672_s21 = sphi %s724_s21, %s827_s21   ;;  %s668_s20 = sphi %s722_s20, %s826_s20   ;;  %s664_s19 = sphi %s720_s19, %s825_s19   ;;  %s660_s18 = sphi %s718_s18, %s824_s18  }
   0x4   : > { %p25_p0 = scmp.ge.s32.totalorder %s24_s23, 2  ;;  %p563_p1 = scmp.ge.s32.totalorder %s676_s22, 1 }
   0x5   : > { %p201_p2 = scmp.lt.s32.totalorder %s676_s22, 5 }
   0x6   : > { %s829_s23 = smov (%p25_p0, %s24_s23), 0  ;;  %s831_s24 = smov (!%p25_p0, %s27_s24), %s672_s21 }
   0x7   : > { %p202_p3 = pnand %p563_p1, %p201_p2  ;;  %p29_p4 = scmp.ge.s32.totalorder %s831_s24, 2 }
   0x8   : > { %p230_p5 = scmp.lt.s32.totalorder (!%p202_p3), %s660_s18, 1  ;;  %s235_s30 = smul.u32 (!%p202_p3), %s660_s18, %s664_s19  ;;  %v767_v3 = vld [vmem:[%s819_s1] sm:$0xff] (!%p202_p3)  ;;  %vm357_vm0 = vcmask (!%p202_p3), 130048   ;;  %vm268_vm1 = vcmask (!%p202_p3), 1039360   ;;  %vm279_vm2 = vcmask (!%p202_p3), 1031168   ;;  %vm290_vm3 = vcmask (!%p202_p3), 916480  }
   0x9   : > { %s833_s24 = smov (%p29_p4, %s831_s24), 0  ;;  %205 = sbr.rel (%p202_p3) target bundleno = 736 (0x2e0), region = 40 }
   0xa   : > { %s678_s6 = smov (!%p202_p3), 127   ;;  %p236_p6 = scmp.lt.s32.totalorder (!%p202_p3), %s235_s30, 1  ;;  %v571_v4 = vcombine.high (!%p202_p3), %v767_v3, %v767_v3  ;;  %vm301_vm4 = vcmask (!%p202_p3), 908288   ;;  %vm312_vm5 = vcmask (!%p202_p3), 900096   ;;  %vm323_vm6 = vcmask (!%p202_p3), 785408  }
   0xb   : > { %s679_s8 = smov (!%p202_p3), 126   ;;  %s680_s12 = smov (!%p202_p3), 112   ;;  %vm334_vm7 = vcmask (!%p202_p3), 777216   ;;  %vm345_vm8 = vcmask (!%p202_p3), 769024   ;;  %v570_v45 = vcombine.low (!%p202_p3), %v767_v3, %v767_v3 }
   0xc   : > { %s681_s13 = smov (!%p202_p3), 111   ;;  %s682_s14 = smov (!%p202_p3), 110   ;;  %572 = vmatprep.mubr.msk.bf16.mxu0 (!%p202_p3), %vm357_vm0, %v571_v4 }
   0xd   : > { %s683_s15 = smov (!%p202_p3), 96   ;;  %p402_p7 = scmp.eq.s32.totalorder (!%p202_p3), %s664_s19, 0 }
   0xe   : > { %p403_p8 = scmp.eq.s32.totalorder (!%p202_p3), %s660_s18, 0 }
  0x10   : > { %s231_s25 = scalar_select %p230_p5, %s660_s18, 1 }
  0x11   : > { %s835_s30 = smov (!%p236_p6, %s235_s30), 1  ;;  %p404_p9 = pnand %p403_p8, %p402_p7 }
  0x12   : > { %s578_s26 = smul.u32 24, %s231_s25  ;;  %s577_s7 = sshll.u32 %s835_s30, 4  ;;  %vm408_vm9 = vcmask (!%p404_p9), 7168   ;;  %v686_v50 = vmov (!%p404_p9), 0.0  }
  0x13   : > { %s762_s11 = scalar_lea.vmem %s823_s5, %s577_s7  ;;  %s684_s25 = smov 95   ;;  %409 = vst.msk [vmem:[#allocation2] sm:$0xff] (!%p404_p9), %vm408_vm9, %v686_v50  ;;  %410 = vst.msk [vmem:[#allocation3] sm:$0xff] (!%p404_p9), %vm408_vm9, %v686_v50 }
  0x14   : > { %s234_s29 = scalar_lea.vmem %s818_s0, %s578_s26  ;;  %s685_s26 = smov 94  }
  0x15   : > { %v629_v0 = vld [vmem:[%s234_s29 + $0x4] ss:$12 sps:$4 sm:$0xff]   ;;  %v631_v1 = vld [vmem:[%s234_s29] ss:$12 sps:$4 sm:$0xff]   ;;  %v632_v2 = vld [vmem:[%s234_s29 + $0x8] ss:$12 sps:$4 sm:$0xff]  }
  0x16   : > { %264 = vrot.lane.b32.xlu0 %v629_v0, %s678_s6  ;;  %361 = vmatprep.subr.bf16.mxu0 %v629_v0 }
  0x17   : > { %262 = vrot.lane.b32.xlu1 %v631_v1, %s678_s6  ;;  %362 = vmatpush1.bf16.msra.mxu0 %v631_v1 }
  0x1a   : > { %266 = vrot.lane.b32.xlu0 %v632_v2, %s678_s6 }
  0x1b   : > { %275 = vrot.lane.b32.xlu1 %v629_v0, %s679_s8 }
  0x1e   : > { %277 = vrot.lane.b32.xlu0 %v632_v2, %s679_s8 }
  0x1f   : > { %273 = vrot.lane.b32.xlu1 %v631_v1, %s679_s8 }
  0x22   : > { %286 = vrot.lane.b32.xlu0 %v629_v0, %s680_s12 }
  0x23   : > { %288 = vrot.lane.b32.xlu1 %v632_v2, %s680_s12 }
  0x26   : > { %284 = vrot.lane.b32.xlu0 %v631_v1, %s680_s12 }
  0x27   : > { %297 = vrot.lane.b32.xlu1 %v629_v0, %s681_s13 }
  0x2a   : > { %299 = vrot.lane.b32.xlu0 %v632_v2, %s681_s13 }
  0x2b   : > { %295 = vrot.lane.b32.xlu1 %v631_v1, %s681_s13 }
  0x2e   : > { %308 = vrot.lane.b32.xlu0 %v629_v0, %s682_s14 }
  0x2f   : > { %310 = vrot.lane.b32.xlu1 %v632_v2, %s682_s14 }
  0x32   : > { %306 = vrot.lane.b32.xlu0 %v631_v1, %s682_s14 }
  0x33   : > { %319 = vrot.lane.b32.xlu1 %v629_v0, %s683_s15 }
  0x36   : > { %321 = vrot.lane.b32.xlu0 %v632_v2, %s683_s15 }
  0x37   : > { %317 = vrot.lane.b32.xlu1 %v631_v1, %s683_s15 }
  0x3a   : > { %330 = vrot.lane.b32.xlu0 %v629_v0, %s684_s25 }
  0x3b   : > { %332 = vrot.lane.b32.xlu1 %v632_v2, %s684_s25 }
  0x3e   : > { %328 = vrot.lane.b32.xlu0 %v631_v1, %s684_s25 }
  0x3f   : > { %341 = vrot.lane.b32.xlu1 %v629_v0, %s685_s26 }
  0x42   : > { %343 = vrot.lane.b32.xlu0 %v632_v2, %s685_s26 }
  0x43   : > { %339 = vrot.lane.b32.xlu1 %v631_v1, %s685_s26 }
  0x88   : > { %v265_v5 = vpop.permute.xlu0 %264 }
  0x89   : > { %v263_v6 = vpop.permute.xlu1 %262 }
  0x8a   : > { %v269_v10 = vsel %vm268_vm1, %v263_v6, %v265_v5 }
  0x8c   : > { %v267_v7 = vpop.permute.xlu0 %266 }
  0x8d   : > { %v276_v8 = vpop.permute.xlu1 %275  ;;  %v270_v9 = vsel %vm268_vm1, %v265_v5, %v267_v7 }
  0x8e   : > { %363 = vmatprep.subr.bf16.mxu0 %v270_v9 }
  0x8f   : > { %364 = vmatpush1.bf16.msra.mxu0 %v269_v10 }
  0x90   : > { %v278_v11 = vpop.permute.xlu0 %277 }
  0x91   : > { %v274_v12 = vpop.permute.xlu1 %273  ;;  %v281_v13 = vsel %vm279_vm2, %v276_v8, %v278_v11 }
  0x92   : > { %365 = vmatprep.subr.bf16.mxu0 %v281_v13  ;;  %v280_v14 = vsel %vm279_vm2, %v274_v12, %v276_v8 }
  0x93   : > { %366 = vmatpush1.bf16.msra.mxu0 %v280_v14 }
  0x94   : > { %v287_v15 = vpop.permute.xlu0 %286 }
  0x95   : > { %v289_v16 = vpop.permute.xlu1 %288 }
  0x96   : > { %v292_v17 = vsel %vm290_vm3, %v287_v15, %v289_v16 }
  0x97   : > { %367 = vmatprep.subr.bf16.mxu0 %v292_v17 }
  0x98   : > { %v285_v18 = vpop.permute.xlu0 %284 }
  0x99   : > { %v298_v19 = vpop.permute.xlu1 %297  ;;  %v291_v20 = vsel %vm290_vm3, %v285_v18, %v287_v15 }
  0x9a   : > { %368 = vmatpush1.bf16.msra.mxu0 %v291_v20 }
  0x9c   : > { %v300_v21 = vpop.permute.xlu0 %299 }
  0x9d   : > { %v296_v22 = vpop.permute.xlu1 %295  ;;  %v303_v23 = vsel %vm301_vm4, %v298_v19, %v300_v21 }
  0x9e   : > { %369 = vmatprep.subr.bf16.mxu0 %v303_v23  ;;  %v302_v24 = vsel %vm301_vm4, %v296_v22, %v298_v19 }
  0x9f   : > { %370 = vmatpush1.bf16.msra.mxu0 %v302_v24 }
  0xa0   : > { %v309_v25 = vpop.permute.xlu0 %308 }
  0xa1   : > { %v311_v26 = vpop.permute.xlu1 %310 }
  0xa2   : > { %v314_v27 = vsel %vm312_vm5, %v309_v25, %v311_v26 }
  0xa3   : > { %371 = vmatprep.subr.bf16.mxu0 %v314_v27 }
  0xa4   : > { %v307_v28 = vpop.permute.xlu0 %306 }
  0xa5   : > { %v320_v29 = vpop.permute.xlu1 %319  ;;  %v313_v30 = vsel %vm312_vm5, %v307_v28, %v309_v25 }
  0xa6   : > { %372 = vmatpush1.bf16.msra.mxu0 %v313_v30 }
  0xa8   : > { %v322_v31 = vpop.permute.xlu0 %321 }
  0xa9   : > { %v318_v32 = vpop.permute.xlu1 %317  ;;  %v325_v33 = vsel %vm323_vm6, %v320_v29, %v322_v31 }
  0xaa   : > { %373 = vmatprep.subr.bf16.mxu0 %v325_v33  ;;  %v324_v34 = vsel %vm323_vm6, %v318_v32, %v320_v29 }
  0xab   : > { %374 = vmatpush1.bf16.msra.mxu0 %v324_v34 }
  0xac   : > { %v331_v35 = vpop.permute.xlu0 %330 }
  0xad   : > { %v333_v36 = vpop.permute.xlu1 %332 }
  0xae   : > { %v336_v37 = vsel %vm334_vm7, %v331_v35, %v333_v36 }
  0xaf   : > { %375 = vmatprep.subr.bf16.mxu0 %v336_v37 }
  0xb0   : > { %v329_v38 = vpop.permute.xlu0 %328 }
  0xb1   : > { %v342_v39 = vpop.permute.xlu1 %341  ;;  %v335_v40 = vsel %vm334_vm7, %v329_v38, %v331_v35 }
  0xb2   : > { %376 = vmatpush1.bf16.msra.mxu0 %v335_v40 }
  0xb4   : > { %v344_v41 = vpop.permute.xlu0 %343 }
  0xb5   : > { %v340_v42 = vpop.permute.xlu1 %339  ;;  %v347_v43 = vsel %vm345_vm8, %v342_v39, %v344_v41 }
  0xb6   : > { %377 = vmatprep.subr.bf16.mxu0 %v347_v43  ;;  %v346_v44 = vsel %vm345_vm8, %v340_v42, %v342_v39 }
  0xb7   : > { %378 = vmatpush1.bf16.msra.mxu0 %v346_v44 }
  0xba   : > { %394 = vmatmul.mubr.bf16.vlgmr.msra.gmra.mrb[0].mxu0 %v570_v45 }
 0x18a   : > { %407 = sbr.rel (%p404_p9) target bundleno = 401 (0x191), region = 44 }
 0x18d   : > { %v777_v46 = vpop.f32.mrb[0].mxu0 }
 0x18e   : > { %v779_v47 = vpop.f32.mrb[1].mxu0 }
 0x18f   : > { %v399_v48 = vpop.f32.mrb[2].mxu0 }
 0x190   : > { %v400_v49 = vpop.f32.mrb[3].mxu0 }
 0x191 PF: > { %p573_p10 = scmp.ne.s32.totalorder %s664_s19, 0 }
 0x192   : > { %v416_v51 = vlaneseq (!%p573_p10)  ;;  %v414_v53 = vld [vmem:[%s822_s4] sm:$0x3] (!%p573_p10)  ;;  %vm433_vm10 = vcmask (!%p573_p10), 7168   ;;  %v435_v3 = vld [vmem:[#allocation3] sm:$0xff] (!%p573_p10) }
 0x193   : > { %413 = sbr.rel (%p573_p10) target bundleno = 563 (0x233), region = 48  ;;  %v428_v0 = vld [vmem:[#allocation2] sm:$0xff] (!%p573_p10) }
 0x194   : > { %v417_v52 = vshrl.u32 (!%p573_p10), %v416_v51, 7 }
 0x196   : > { %v418_v54 = vsub.s32 (!%p573_p10), 0, %v417_v52  ;;  %v422_v55 = vsub.s32 (!%p573_p10), 1, %v417_v52 }
 0x198   : > { %v419_v56 = vrot.slane (!%p573_p10), %v414_v53, %v418_v54  ;;  %v423_v57 = vrot.slane (!%p573_p10), %v414_v53, %v422_v55 }
 0x19a   : > { %v426_v58 = vmul.f32 %v419_v56, %v777_v46  ;;  %v427_v59 = vmul.f32 %v423_v57, %v779_v47 }
 0x19c   : > { %v429_v60 = vadd.f32 %v427_v59, %v426_v58  ;;  %v436_v61 = vmul.f32 %v426_v58, %v777_v46  ;;  %v437_v62 = vmul.f32 %v427_v59, %v779_v47 }
 0x19e   : > { %430 = vadd.xlane.f32.xlu0 %v429_v60  ;;  %v438_v63 = vadd.f32 %v437_v62, %v436_v61 }
 0x1a2   : > { %439 = vadd.xlane.f32.xlu0 %v438_v63 }
 0x22b   : > { %v431_v1 = vpop.xlane.xlu0 %430 }
 0x22c   : > { %v432_v2 = vadd.f32 %v431_v1, %v428_v0 }
 0x22e   : > { %434 = vst.msk [vmem:[#allocation2] sm:$0xff] %vm433_vm10, %v432_v2 }
 0x22f   : > { %v440_v4 = vpop.xlane.xlu0 %439 }
 0x230   : > { %v441_v5 = vadd.f32 %v440_v4, %v435_v3 }
 0x232   : > { %442 = vst.msk [vmem:[#allocation3] sm:$0xff] %vm433_vm10, %v441_v5 }
 0x233 PF: > { %p443_p11 = scmp.eq.s32.totalorder %s660_s18, 1 }
 0x235   : > { %p444_p12 = pnand %p443_p11, %p402_p7 }
 0x236   : > { %v448_v6 = vld [vmem:[#allocation2] sm:$0xff] (!%p444_p12)  ;;  %vm459_vm11 = vcmask (!%p444_p12), 7168  }
 0x237   : > { %447 = sbr.rel (%p444_p12) target bundleno = 596 (0x254), region = 52  ;;  %v449_v8 = vmul.f32 (!%p444_p12), 0.0025510204, %v448_v6  ;;  %v455_v14 = vld [vmem:[%s820_s2] sm:$0xff] (!%p444_p12) }
 0x238   : > { %v461_v17 = vld [vmem:[%s821_s3] sm:$0xff] (!%p444_p12) }
 0x239   : > { %v450_v7 = vld [vmem:[#allocation3] sm:$0xff] (!%p444_p12)  ;;  %v452_v10 = vmul.f32 (!%p444_p12), %v449_v8, %v449_v8 }
 0x23a   : > { %v451_v9 = vmul.f32 (!%p444_p12), 0.0025510204, %v450_v7 }
 0x23c   : > { %v453_v11 = vsub.f32 (!%p444_p12), %v451_v9, %v452_v10 }
 0x23e   : > { %v454_v12 = vmax.f32 %v453_v11, 0.0 }
 0x240   : > { %v456_v13 = vadd.f32 1e-05, %v454_v12 }
 0x242   : > { %635 = vrsqrt.f32 %v456_v13 }
 0x24c   : > { %v636_v15 = vpop.eup %635 }
 0x24d   : > { %v458_v16 = vmul.f32 %v636_v15, %v455_v14 }
 0x24f   : > { %460 = vst.msk [vmem:[#allocation4] sm:$0xff] %vm459_vm11, %v458_v16  ;;  %v462_v18 = vmul.f32 %v458_v16, %v449_v8 }
 0x251   : > { %v463_v19 = vsub.f32 %v461_v17, %v462_v18 }
 0x253   : > { %464 = vst.msk [vmem:[#allocation5] sm:$0xff] %vm459_vm11, %v463_v19 }
 0x254 PF: > { %p574_p13 = scmp.ne.s32.totalorder %s664_s19, 1 }
 0x255   : > { %v687_v21 = vmov (!%p574_p13), 0  }
 0x256   : > { %468 = sbr.rel (%p574_p13) target bundleno = 736 (0x2e0), region = 56  ;;  %v469_v20 = vld [vmem:[#allocation4] sm:$0xff] (!%p574_p13)  ;;  %637 = vset.pattern.permute.xlu0 (!%p574_p13), %v687_v21 }
 0x257   : > { %472 = vperm.xlu0 (!%p574_p13), %637, %v469_v20  }
 0x25a   : > { %v477_v22 = vld [vmem:[#allocation5] sm:$0xff] (!%p574_p13) }
 0x25b   : > { %480 = vperm.xlu0 (!%p574_p13), %637, %v477_v22  }
 0x2d6   : > { %v473_v23 = vpop.permute.xlu0 %472 }
 0x2d7   : > { %v475_v24 = vmul.f32 %v473_v23, %v777_v46  ;;  %v476_v25 = vmul.f32 %v473_v23, %v779_v47 }
 0x2da   : > { %v481_v26 = vpop.permute.xlu0 %480 }
 0x2db   : > { %v483_v27 = vadd.f32 %v481_v26, %v475_v24  ;;  %v484_v28 = vadd.f32 %v481_v26, %v476_v25 }
 0x2dd   : > { %v485_v29 = vmax.f32 %v483_v27, 0.0  ;;  %v486_v30 = vmax.f32 %v484_v28, 0.0 }
 0x2df   : > { %487 = vst [vmem:[%s762_s11] sm:$0xff] %v485_v29  ;;  %488 = vst [vmem:[%s762_s11 + $0x8] sm:$0xff] %v486_v30 }
 0x2e0 PF: > { %s15_s22 = sadd.s32 1, %s676_s22   ;;  %s824_s18 = smov %s668_s20 }
 0x2e1   : > { %p12_p0 = scmp.ge.s32.totalorder %s15_s22, 6   ;;  %s825_s19 = smov %s672_s21 }
 0x2e2   : > { %s826_s20 = smov %s829_s23  ;;  %s827_s21 = smov %s833_s24 }
 0x2e3   :  { %14 = sbr.rel (!%p12_p0) target bundleno = 3 (0x3), region = 86 }

</bundles_post_ra>
